<compile_context>
chip_gen: v5e
topology: v5e:2x2
jax: 0.10.0
libtpu: 0.0.40
codegen_flags: <defaults>
</compile_context>

<pallas_src>
import jax
import jax.numpy as jnp
from jax.experimental import pallas as pl
from jax.experimental.pallas import tpu as pltpu


def _stack_bounds_dma_kernel(lb_ref, ub_ref, out_ref, sem):
    # lb_ref/ub_ref: (rows, cols) HBM refs; out_ref: (2, rows, cols) HBM ref.
    # Two direct HBM->HBM DMAs; start both before waiting so they overlap.
    cp_lb = pltpu.make_async_copy(lb_ref, out_ref.at[0], sem.at[0])
    cp_ub = pltpu.make_async_copy(ub_ref, out_ref.at[1], sem.at[1])
    cp_lb.start()
    cp_ub.start()
    cp_lb.wait()
    cp_ub.wait()


def input_transformer_forward(bounds, assignment, input_shape):
    """Pallas implementation of InputTransformer.forward.

    bounds: tuple (lb, ub) of flat arrays with prod(input_shape[1:]) elements.
    input_shape: (N, C, H, W) -- only input_shape[1:] is used (as in the module).
    Returns (stacked_bounds, None) where stacked_bounds equals
    squeeze(stack([lb.view(C,H,W), ub.view(C,H,W)], 0)).
    """
    del assignment  # unused, as in the PyTorch module
    lb, ub = bounds[0], bounds[1]

    tgt_shape = tuple(int(d) for d in input_shape[1:])   # (C, H, W)
    n_elems = 1
    for d in tgt_shape:
        n_elems *= d

    # torch.stack requires a single dtype; promote to a common one explicitly
    # so the DMA src/dst dtypes always match (no silent cast inside the kernel).
    out_dtype = jnp.result_type(lb.dtype, ub.dtype)
    lb = lb.astype(out_dtype)
    ub = ub.astype(out_dtype)

    # Layout glue: present each bound as a contiguous, lane-dense 2D slab.
    # (For the DMA path any rectangular shape is correct; (n/128, 128) keeps
    # the copy fully contiguous and layout-friendly.)
    if n_elems % 128 == 0:
        rows, cols = n_elems // 128, 128
    else:
        rows, cols = 1, n_elems
    lb2d = jnp.reshape(lb, (rows, cols))
    ub2d = jnp.reshape(ub, (rows, cols))

    out2d = pl.pallas_call(
        _stack_bounds_dma_kernel,
        out_shape=jax.ShapeDtypeStruct((2, rows, cols), out_dtype),
        in_specs=[
            pl.BlockSpec(memory_space=pl.ANY),   # raw HBM ref, no auto-DMA
            pl.BlockSpec(memory_space=pl.ANY),
        ],
        out_specs=pl.BlockSpec(memory_space=pl.ANY),
        scratch_shapes=[pltpu.SemaphoreType.DMA((2,))],
    )(lb2d, ub2d)

    stacked = jnp.reshape(out2d, (2,) + tgt_shape)
    stacked = jnp.squeeze(stacked)               # torch .squeeze(): drop all size-1 dims
    return stacked, None


if __name__ == "__main__":
    # Small deterministic example consistent with NCHW input_shape = (1, 4, 16, 16).
    input_shape = (1, 4, 16, 16)
    n = input_shape[1] * input_shape[2] * input_shape[3]

    key = jax.random.PRNGKey(0)
    k1, k2 = jax.random.split(key)
    center = jax.random.normal(k1, (n,), dtype=jnp.float32)
    eps = 0.1 * jnp.abs(jax.random.normal(k2, (n,), dtype=jnp.float32))
    lb = center - eps
    ub = center + eps

    out, _none = input_transformer_forward((lb, ub), assignment=None,
                                           input_shape=input_shape)
    out = jax.block_until_ready(out)

    # Reference check (pure JAX mirror of the PyTorch semantics).
    ref = jnp.squeeze(
        jnp.stack([jnp.reshape(lb, input_shape[1:]),
                   jnp.reshape(ub, input_shape[1:])], 0)
    )
    assert out.shape == ref.shape == (2, 4, 16, 16), out.shape
    assert jnp.allclose(out, ref), "mismatch vs reference"
    assert _none is None

    print("KERNEL_OK")
</pallas_src>

<mosaic_0001>
module attributes {stable_mosaic.version = 11 : i64} {
  func.func @_stack_bounds_dma_kernel(%arg0: memref<8x128xf32, #tpu.memory_space<any>>, %arg1: memref<8x128xf32, #tpu.memory_space<any>>, %arg2: memref<2x8x128xf32, #tpu.memory_space<any>>, %arg3: memref<2x!tpu.dma_semaphore, #tpu.memory_space<semaphore_mem>>) attributes {dimension_semantics = [], scalar_prefetch = 0 : i64, scratch_operands = 1 : i64, tpu.core_type = #tpu.core_type<tc>} {
    %c0_i32 = arith.constant 0 : i32
    %c0_i32_0 = arith.constant 0 : i32
    %c0_i32_1 = arith.constant 0 : i32
    %c0_i32_2 = arith.constant 0 : i32
    %0 = tpu.memref_slice %arg2[%c0_i32, %c0_i32_1, %c0_i32_2] : memref<2x8x128xf32, #tpu.memory_space<any>> -> memref<1x8x128xf32, #tpu.memory_space<any>>
    %1 = tpu.memref_squeeze %0 : memref<1x8x128xf32, #tpu.memory_space<any>> -> memref<8x128xf32, #tpu.memory_space<any>>
    %2 = tpu.memref_slice %arg3[%c0_i32_0] : memref<2x!tpu.dma_semaphore, #tpu.memory_space<semaphore_mem>> -> memref<1x!tpu.dma_semaphore, #tpu.memory_space<semaphore_mem>>
    %3 = tpu.memref_squeeze %2 : memref<1x!tpu.dma_semaphore, #tpu.memory_space<semaphore_mem>> -> memref<!tpu.dma_semaphore, #tpu.memory_space<semaphore_mem>>
    tpu.enqueue_dma source(%arg0 : memref<8x128xf32, #tpu.memory_space<any>>) target(%1 : memref<8x128xf32, #tpu.memory_space<any>>) target_semaphore(%3 : memref<!tpu.dma_semaphore, #tpu.memory_space<semaphore_mem>>)
    %c1_i32 = arith.constant 1 : i32
    %c1_i32_3 = arith.constant 1 : i32
    %c0_i32_4 = arith.constant 0 : i32
    %c0_i32_5 = arith.constant 0 : i32
    %4 = tpu.memref_slice %arg2[%c1_i32, %c0_i32_4, %c0_i32_5] : memref<2x8x128xf32, #tpu.memory_space<any>> -> memref<1x8x128xf32, #tpu.memory_space<any>>
    %5 = tpu.memref_squeeze %4 : memref<1x8x128xf32, #tpu.memory_space<any>> -> memref<8x128xf32, #tpu.memory_space<any>>
    %6 = tpu.memref_slice %arg3[%c1_i32_3] : memref<2x!tpu.dma_semaphore, #tpu.memory_space<semaphore_mem>> -> memref<1x!tpu.dma_semaphore, #tpu.memory_space<semaphore_mem>>
    %7 = tpu.memref_squeeze %6 : memref<1x!tpu.dma_semaphore, #tpu.memory_space<semaphore_mem>> -> memref<!tpu.dma_semaphore, #tpu.memory_space<semaphore_mem>>
    tpu.enqueue_dma source(%arg1 : memref<8x128xf32, #tpu.memory_space<any>>) target(%5 : memref<8x128xf32, #tpu.memory_space<any>>) target_semaphore(%7 : memref<!tpu.dma_semaphore, #tpu.memory_space<semaphore_mem>>)
    %c0_i32_6 = arith.constant 0 : i32
    %c0_i32_7 = arith.constant 0 : i32
    %c0_i32_8 = arith.constant 0 : i32
    %c0_i32_9 = arith.constant 0 : i32
    %8 = tpu.memref_slice %arg2[%c0_i32_6, %c0_i32_8, %c0_i32_9] : memref<2x8x128xf32, #tpu.memory_space<any>> -> memref<1x8x128xf32, #tpu.memory_space<any>>
    %9 = tpu.memref_squeeze %8 : memref<1x8x128xf32, #tpu.memory_space<any>> -> memref<8x128xf32, #tpu.memory_space<any>>
    %10 = tpu.memref_slice %arg3[%c0_i32_7] : memref<2x!tpu.dma_semaphore, #tpu.memory_space<semaphore_mem>> -> memref<1x!tpu.dma_semaphore, #tpu.memory_space<semaphore_mem>>
    %11 = tpu.memref_squeeze %10 : memref<1x!tpu.dma_semaphore, #tpu.memory_space<semaphore_mem>> -> memref<!tpu.dma_semaphore, #tpu.memory_space<semaphore_mem>>
    tpu.wait_dma2 semaphore(%11 : memref<!tpu.dma_semaphore, #tpu.memory_space<semaphore_mem>>) src(%arg0 : memref<8x128xf32, #tpu.memory_space<any>>) dst(%9 : memref<8x128xf32, #tpu.memory_space<any>>)
    %c1_i32_10 = arith.constant 1 : i32
    %c1_i32_11 = arith.constant 1 : i32
    %c0_i32_12 = arith.constant 0 : i32
    %c0_i32_13 = arith.constant 0 : i32
    %12 = tpu.memref_slice %arg2[%c1_i32_10, %c0_i32_12, %c0_i32_13] : memref<2x8x128xf32, #tpu.memory_space<any>> -> memref<1x8x128xf32, #tpu.memory_space<any>>
    %13 = tpu.memref_squeeze %12 : memref<1x8x128xf32, #tpu.memory_space<any>> -> memref<8x128xf32, #tpu.memory_space<any>>
    %14 = tpu.memref_slice %arg3[%c1_i32_11] : memref<2x!tpu.dma_semaphore, #tpu.memory_space<semaphore_mem>> -> memref<1x!tpu.dma_semaphore, #tpu.memory_space<semaphore_mem>>
    %15 = tpu.memref_squeeze %14 : memref<1x!tpu.dma_semaphore, #tpu.memory_space<semaphore_mem>> -> memref<!tpu.dma_semaphore, #tpu.memory_space<semaphore_mem>>
    tpu.wait_dma2 semaphore(%15 : memref<!tpu.dma_semaphore, #tpu.memory_space<semaphore_mem>>) src(%arg1 : memref<8x128xf32, #tpu.memory_space<any>>) dst(%13 : memref<8x128xf32, #tpu.memory_space<any>>)
    return
  }
}

</mosaic_0001>

<bundles_post_ra>
// kernel: tpu_custom_call.1
= control target key start
LH: loop header
LB: loop body
LE: loop exit
PB: predicated region body
PF: predicated region fallthrough
CT: control target
= control target key end

     0   :  { %s60_s18 = smov [#allocation2]   ;;  %s61_s19 = smov [#allocation3]   ;;  %s92_s0 = inlined_call_operand.hbm [shape: f32[8,128], index: 0, kind: input, shape index: {}]   ;;  %s93_s2 = inlined_call_operand.hbm [shape: f32[2,8,128], index: 2, kind: output, shape index: {}]   ;;  %s94_s1 = inlined_call_operand.hbm [shape: f32[8,128], index: 1, kind: input, shape index: {}]  }
   0x1   :  { %s11_s11 = sshll.u32 %s92_s0, 4  ;;  %s13_s14 = sshll.u32 %s93_s2, 4  ;;  %s12_s11 = int_to_ptr.hbm [resolvable:$true] %s11_s11  ;;  %s14_s14 = int_to_ptr.hbm [resolvable:$true] %s13_s14 }
   0x2   :  { %s18_s17 = scalar_lea.hbm %s93_s2, 8  ;;  %s62_s20 = smov 0  }
   0x3   :  { %17 = dma.general %s12_s11, 128, %s14_s14, %s60_s18, %s61_s19, [#allocation4], %s62_s20, 0  }
   0x4   :  { %s26_s21 = sshll.u32 %s18_s17, 4  ;;  %s24_s24 = sshll.u32 %s94_s1, 4  ;;  %s25_s24 = int_to_ptr.hbm [resolvable:$true] %s24_s24  ;;  %s27_s21 = int_to_ptr.hbm [resolvable:$true] %s26_s21 }
   0x5   :  { %s63_s0 = smov [#allocation2 + $0x1]   ;;  %s64_s25 = smov [#allocation5]  }
   0x6   :  { %30 = dma.general %s25_s24, 128, %s27_s21, %s63_s0, %s64_s25, [#allocation6], %s62_s20, 0  }
   0x7   :  { %56 = dma.done.wait [#allocation2], 128 }
   0x8   :  { %57 = vsyncadd [#allocation2], 4294967168 }
   0x9   :  { %58 = dma.done.wait [#allocation2 + $0x1], 128 }
   0xa   :  { %59 = vsyncadd [#allocation2 + $0x1], 4294967168 }
   0xb   :  { %36 = vsyncmov [#allocation2] }
   0xe   :  { %s37_s2 = vpop.sfrf %36 }
   0xf   :  { %p49_p0 = scmp.ne.s32.totalorder %s37_s2, 0 }
  0x11   :  { %41 = shalt.err (%p49_p0)  }
  0x12   :  { %43 = vsyncmov [#allocation2 + $0x1] }
  0x15   :  { %s44_s26 = vpop.sfrf %43 }
  0x16   :  { %p50_p1 = scmp.ne.s32.totalorder %s44_s26, 0 }
  0x18   :  { %48 = shalt.err (%p50_p1)  }

</bundles_post_ra>
